<compile_context>
chip_gen: v7x
topology: tpu7x:2x2x1
jax: 0.10.0
libtpu: 0.0.40
codegen_flags: <defaults>
</compile_context>

<pallas_src>
import jax
import jax.numpy as jnp
from jax.experimental import pallas as pl
from jax.experimental.pallas import tpu as pltpu


def time_embedding_kernel(x_ref, w1_ref, b1_ref, w2_ref, b2_ref, o_ref):
    # --- linear1 + SiLU (tiny; recomputed per column tile so grid points are
    # fully independent -> safe to mark the grid axis "parallel").  x/w1/b1
    # block indices never change, so their DMAs happen only once per core.
    x = x_ref[...].astype(w1_ref.dtype)
    h = jnp.dot(x, w1_ref[...], preferred_element_type=jnp.float32)
    h = h + b1_ref[...].astype(jnp.float32)
    h = h * jax.nn.sigmoid(h)                       # SiLU in f32 (VPU + EUP)

    # --- linear2, one (hidden, TN) column tile of w2 per grid step.
    out = jnp.dot(h.astype(w2_ref.dtype), w2_ref[...],
                  preferred_element_type=jnp.float32)
    out = out + b2_ref[...].astype(jnp.float32)
    o_ref[...] = out.astype(o_ref.dtype)


def time_embedding(x, w1, b1, w2, b2, *, tn=512):
    """TimeEmbedding forward.

    x : (B, dim)          input time embedding
    w1: (dim, 4*dim)      linear1 weight, pre-transposed (in, out)
    b1: (1, 4*dim)        linear1 bias
    w2: (4*dim, 4*dim)    linear2 weight, pre-transposed (in, out)
    b2: (1, 4*dim)        linear2 bias
    tn: column tile of w2 / output (multiple of 128; 256/512 ideal on v6e/v7x)
    """
    batch, dim = x.shape
    hidden = 4 * dim
    assert w1.shape == (dim, hidden)
    assert b1.shape == (1, hidden)
    assert w2.shape == (hidden, hidden)
    assert b2.shape == (1, hidden)

    tn = min(tn, hidden)
    assert tn % 128 == 0, "column tile must be lane-dense (multiple of 128)"
    assert hidden % tn == 0, "hidden must be divisible by the column tile"
    grid = (hidden // tn,)

    itemsize = {jnp.dtype(jnp.bfloat16): 2}.get(jnp.dtype(w1.dtype), 4)
    cost = pl.CostEstimate(
        flops=2 * batch * dim * hidden + 2 * batch * hidden * hidden,
        transcendentals=batch * hidden,  # sigmoid
        bytes_accessed=(x.size * x.dtype.itemsize
                        + (w1.size + b1.size + w2.size + b2.size) * itemsize
                        + batch * hidden * x.dtype.itemsize),
    )

    return pl.pallas_call(
        time_embedding_kernel,
        out_shape=jax.ShapeDtypeStruct((batch, hidden), x.dtype),
        grid_spec=pltpu.PrefetchScalarGridSpec(
            num_scalar_prefetch=0,
            grid=grid,
            in_specs=[
                pl.BlockSpec((batch, dim), lambda j: (0, 0)),     # x (resident)
                pl.BlockSpec((dim, hidden), lambda j: (0, 0)),    # w1 (resident)
                pl.BlockSpec((1, hidden), lambda j: (0, 0)),      # b1 (resident)
                pl.BlockSpec((hidden, tn), lambda j: (0, j)),     # w2 (streamed)
                pl.BlockSpec((1, tn), lambda j: (0, j)),          # b2 (streamed)
            ],
            out_specs=pl.BlockSpec((batch, tn), lambda j: (0, j)),
        ),
        compiler_params=pltpu.CompilerParams(
            dimension_semantics=("parallel",),   # shard column tiles across TCs (v7x)
            vmem_limit_bytes=32 << 20,
        ),
        cost_estimate=cost,
    )(x, w1, b1, w2, b2)


def time_embedding_ref(x, w1, b1, w2, b2):
    # f32 reference using the (possibly bf16) parameters upcast to f32.
    xf = x.astype(jnp.float32)
    h = xf @ w1.astype(jnp.float32) + b1.astype(jnp.float32)
    h = h * jax.nn.sigmoid(h)
    out = h @ w2.astype(jnp.float32) + b2.astype(jnp.float32)
    return out.astype(x.dtype)


if __name__ == "__main__":
    # Small shapes consistent with the module: dim=64 -> hidden=256, batch=8.
    # tn=128 so the grid has 2 steps and the streamed-w2 path is exercised.
    batch, dim = 8, 64
    hidden = 4 * dim

    key = jax.random.PRNGKey(0)
    kx, kw1, kb1, kw2, kb2 = jax.random.split(key, 5)

    x = jax.random.normal(kx, (batch, dim), dtype=jnp.float32)
    # Parameters stored transposed as (in, out), bf16 (native MXU dtype).
    w1 = (jax.random.normal(kw1, (dim, hidden), dtype=jnp.float32) * 0.05
          ).astype(jnp.bfloat16)
    b1 = (jax.random.normal(kb1, (1, hidden), dtype=jnp.float32) * 0.05
          ).astype(jnp.bfloat16)
    w2 = (jax.random.normal(kw2, (hidden, hidden), dtype=jnp.float32) * 0.05
          ).astype(jnp.bfloat16)
    b2 = (jax.random.normal(kb2, (1, hidden), dtype=jnp.float32) * 0.05
          ).astype(jnp.bfloat16)

    out = time_embedding(x, w1, b1, w2, b2, tn=128)
    out = jax.block_until_ready(out)

    ref = time_embedding_ref(x, w1, b1, w2, b2)
    assert out.shape == (batch, hidden)
    # bf16 MXU inputs with f32 accumulation -> slightly looser tolerance.
    assert jnp.allclose(out, ref, atol=1e-2, rtol=1e-2), "mismatch vs JAX reference"

    print("KERNEL_OK")
</pallas_src>

<mosaic_0001>
module attributes {stable_mosaic.version = 11 : i64} {
  func.func @time_embedding_kernel(%arg0: i32, %arg1: memref<8x64xf32, #tpu.memory_space<vmem>>, %arg2: memref<64x256xbf16, #tpu.memory_space<vmem>>, %arg3: memref<1x256xbf16, #tpu.memory_space<vmem>>, %arg4: memref<256x128xbf16, #tpu.memory_space<vmem>>, %arg5: memref<1x128xbf16, #tpu.memory_space<vmem>>, %arg6: memref<8x128xf32, #tpu.memory_space<vmem>>) attributes {dimension_semantics = [#tpu.dimension_semantics<parallel>], iteration_bounds = array<i64: 2>, scalar_prefetch = 0 : i64, scratch_operands = 0 : i64, tpu.core_type = #tpu.core_type<tc>, window_params = [{pipeline_mode = #tpu.pipeline_mode<synchronous>, transform_indices = @transform_0, window_bounds = array<i64: 8, 64>}, {pipeline_mode = #tpu.pipeline_mode<synchronous>, transform_indices = @transform_1, window_bounds = array<i64: 64, 256>}, {pipeline_mode = #tpu.pipeline_mode<synchronous>, transform_indices = @transform_2, window_bounds = array<i64: 1, 256>}, {transform_indices = @transform_3, window_bounds = array<i64: 256, 128>}, {transform_indices = @transform_4, window_bounds = array<i64: 1, 128>}, {transform_indices = @transform_5, window_bounds = array<i64: 8, 128>}]} {
    %c0 = arith.constant 0 : index
    %c0_0 = arith.constant 0 : index
    %0 = vector.load %arg1[%c0, %c0_0] : memref<8x64xf32, #tpu.memory_space<vmem>>, vector<8x64xf32>
    %1 = arith.truncf %0 : vector<8x64xf32> to vector<8x64xbf16>
    %c0_1 = arith.constant 0 : index
    %c0_2 = arith.constant 0 : index
    %2 = vector.load %arg2[%c0_1, %c0_2] : memref<64x256xbf16, #tpu.memory_space<vmem>>, vector<64x256xbf16>
    %cst = arith.constant dense<0.000000e+00> : vector<8x256xf32>
    %3 = tpu.matmul %1, %2, %cst {dimension_numbers = #tpu.dot_dimension_numbers<[1], [0], [0], [1], [0, 0, 1, 1], [], []>} : vector<8x64xbf16>, vector<64x256xbf16>, vector<8x256xf32> -> vector<8x256xf32>
    %c0_3 = arith.constant 0 : index
    %c0_4 = arith.constant 0 : index
    %4 = vector.load %arg3[%c0_3, %c0_4] : memref<1x256xbf16, #tpu.memory_space<vmem>>, vector<1x256xbf16>
    %5 = arith.extf %4 : vector<1x256xbf16> to vector<1x256xf32>
    %6 = vector.broadcast %5 : vector<1x256xf32> to vector<8x256xf32>
    %7 = arith.addf %3, %6 : vector<8x256xf32>
    %8 = arith.negf %7 : vector<8x256xf32>
    %9 = math.exp %8 : vector<8x256xf32>
    %cst_5 = arith.constant 1.000000e+00 : f32
    %10 = vector.broadcast %cst_5 : f32 to vector<8x256xf32>
    %11 = arith.addf %10, %9 : vector<8x256xf32>
    %12 = arith.divf %10, %11 : vector<8x256xf32>
    %13 = arith.mulf %7, %12 : vector<8x256xf32>
    %14 = arith.truncf %13 : vector<8x256xf32> to vector<8x256xbf16>
    %c0_6 = arith.constant 0 : index
    %c0_7 = arith.constant 0 : index
    %15 = vector.load %arg4[%c0_6, %c0_7] : memref<256x128xbf16, #tpu.memory_space<vmem>>, vector<256x128xbf16>
    %cst_8 = arith.constant dense<0.000000e+00> : vector<8x128xf32>
    %16 = tpu.matmul %14, %15, %cst_8 {dimension_numbers = #tpu.dot_dimension_numbers<[1], [0], [0], [1], [0, 0, 1, 1], [], []>} : vector<8x256xbf16>, vector<256x128xbf16>, vector<8x128xf32> -> vector<8x128xf32>
    %c0_9 = arith.constant 0 : index
    %c0_10 = arith.constant 0 : index
    %17 = vector.load %arg5[%c0_9, %c0_10] : memref<1x128xbf16, #tpu.memory_space<vmem>>, vector<1x128xbf16>
    %18 = arith.extf %17 : vector<1x128xbf16> to vector<1x128xf32>
    %19 = vector.broadcast %18 : vector<1x128xf32> to vector<8x128xf32>
    %20 = arith.addf %16, %19 : vector<8x128xf32>
    %c0_11 = arith.constant 0 : index
    %c0_12 = arith.constant 0 : index
    %21 = vector.load %arg6[%c0_11, %c0_12] : memref<8x128xf32, #tpu.memory_space<vmem>>, vector<8x128xf32>
    tpu.vector_store %arg6[%c0_11, %c0_12], %20 {strides = array<i32>} : memref<8x128xf32, #tpu.memory_space<vmem>>, vector<8x128xf32>,
    return
  }
  func.func @transform_0(%arg0: i32) -> (i32, i32) {
    %c0_i32 = arith.constant 0 : i32
    %c0_i32_0 = arith.constant 0 : i32
    %c0_i32_1 = arith.constant 0 : i32
    return %c0_i32, %c0_i32_0 : i32, i32
  }
  func.func @transform_1(%arg0: i32) -> (i32, i32) {
    %c0_i32 = arith.constant 0 : i32
    %c0_i32_0 = arith.constant 0 : i32
    %c0_i32_1 = arith.constant 0 : i32
    return %c0_i32, %c0_i32_0 : i32, i32
  }
  func.func @transform_2(%arg0: i32) -> (i32, i32) {
    %c0_i32 = arith.constant 0 : i32
    %c0_i32_0 = arith.constant 0 : i32
    %c0_i32_1 = arith.constant 0 : i32
    return %c0_i32, %c0_i32_0 : i32, i32
  }
  func.func @transform_3(%arg0: i32) -> (i32, i32) {
    %c0_i32 = arith.constant 0 : i32
    %c0_i32_0 = arith.constant 0 : i32
    return %c0_i32, %arg0 : i32, i32
  }
  func.func @transform_4(%arg0: i32) -> (i32, i32) {
    %c0_i32 = arith.constant 0 : i32
    %c0_i32_0 = arith.constant 0 : i32
    return %c0_i32, %arg0 : i32, i32
  }
  func.func @transform_5(%arg0: i32) -> (i32, i32) {
    %c0_i32 = arith.constant 0 : i32
    %c0_i32_0 = arith.constant 0 : i32
    return %c0_i32, %arg0 : i32, i32
  }
}

</mosaic_0001>

<bundles_post_ra>
// kernel: tpu_custom_call.1
= control target key start
LH: loop header
LB: loop body
LE: loop exit
PB: predicated region body
PF: predicated region fallthrough
CT: control target
= control target key end

     0   :  { %s1339_s0 = inlined_call_operand.hbm [shape: f32[8,64], index: 0, kind: input, shape index: {}]   ;;  %s1340_s1 = inlined_call_operand.hbm [shape: bf16[64,256], index: 1, kind: input, shape index: {}]   ;;  %s1341_s2 = inlined_call_operand.vmem [shape: bf16[1,256], index: 2, kind: input, shape index: {}]   ;;  %s1342_s3 = inlined_call_operand.hbm [shape: bf16[256,256], index: 3, kind: input, shape index: {}]   ;;  %s1343_s4 = inlined_call_operand.vmem [shape: bf16[1,256], index: 4, kind: input, shape index: {}]   ;;  %s1344_s5 = inlined_call_operand.hbm [shape: f32[8,256], index: 5, kind: output, shape index: {}]  }
   0x1   :  { %1350 = sst [smem:[#allocation14_spill]] %s1339_s0 }
   0x2   :  { %10 = vsyncpa [#allocation3], 0 }
   0x3   :  { %11 = vsyncpa [#allocation6], 0 }
   0x4   :  { %12 = vsyncpa [#allocation4], 0 }
   0x5   :  { %14 = vsyncpa [#allocation4 + $0x1], 0  ;;  %s1075_s18 = smov 0   ;;  %s1077_s19 = smov 0  }
   0x6   :  { %s1079_s20 = smov 0   ;;  %s1081_s21 = smov 0  }
   0x7 LB: > { %s1096_s22 = sadd.s32 4294967295, %s1034_s21   ;;  %s701_s23 = sadd.s32 4294967294, %s1034_s21   ;;  %s1034_s21 = sphi %s1081_s21, %s1375_s21   ;;  %s1030_s20 = sphi %s1079_s20, %s1374_s20   ;;  %s1026_s19 = sphi %s1077_s19, %s1373_s19   ;;  %s1022_s18 = sphi %s1075_s18, %s1372_s18  }
   0x8   : > { %s1100_s24 = sadd.s32 1, %s1034_s21   ;;  %s90_s25 = sadd.s32 1, %s1030_s20 }
   0x9   : > { %s87_s26 = ssub.s32 %s1034_s21, %s1100_s24  ;;  %p97_p0 = scmp.ne.s32.totalorder %s1030_s20, %s1026_s19 }
   0xa   : > { %p88_p1 = scmp.eq.s32.totalorder %s87_s26, 0  ;;  %p98_p2 = scmp.eq.s32.totalorder %s1034_s21, 0 }
   0xb   : > { %p103_p3 = scmp.ne.s32.totalorder %s1026_s19, %s1022_s18  ;;  %p1345_p4 = scmp.eq.s32.totalorder %s1096_s22, 0 }
   0xc   : > { %s1112_s27 = scalar_select %p88_p1, %s1030_s20, %s90_s25  }
   0xd   : > { %p1114_p5 = por %p98_p2, %p97_p0  ;;  %p1120_p6 = por %p1345_p4, %p103_p3 }
   0xe   : > { %1351 = sst [smem:[#allocation13_spill]] %s1112_s27  ;;  %p153_p7 = scmp.eq.s32.totalorder %s1096_s22, 1 }
   0xf   : > { %s1353_s29 = scalar_select %p1120_p6, 1, 0 }
  0x10   : > { %p159_p8 = scmp.eq.s32.totalorder %s701_s23, 1  ;;  %p702_p9 = scmp.ge.s32.totalorder %s1034_s21, 1 }
  0x11   : > { %p166_p10 = scmp.lt.s32.totalorder %s1034_s21, 3  ;;  %p1127_p11 = por %p153_p7, %p97_p0 }
  0x12   : > { %p1131_p12 = por %p159_p8, %p103_p3  ;;  %s1036_s8 = smov [#allocation2]  }
  0x13   : > { %s1354_s30 = scalar_select %p1127_p11, 1, 0 }
  0x14   : > { %s1355_s6 = scalar_select %p1131_p12, 1, 0 }
  0x15   : > { %p1135_p13 = pnand %p702_p9, %p166_p10  ;;  %s179_s9 = sshll.u32 %s1036_s8, 4  ;;  %s180_s9 = int_to_ptr.vmem [resolvable:$true] %s179_s9 }
  0x16   : > { %p795_p4 = scmp.lt.s32.totalorder %s1034_s21, 2  ;;  %p1357_p0 = scmp.eq.s32.totalorder %s1096_s22, 0 }
  0x17   : > { %s1356_s7 = scalar_select %p1135_p13, 1, 0 }
  0x18   : > { %p778_p2 = pneg %p1135_p13  ;;  %p1151_p3 = pnand %p795_p4, %p1114_p5 }
  0x19   : > { %s1037_s12 = smov [#allocation5]   ;;  %s1360_s0 = sld [smem:[#allocation14_spill]] }
  0x1a   : > { %p1145_p7 = pnand %p778_p2, %p1357_p0  ;;  %s189_s13 = sshll.u32 %s1037_s12, 4  ;;  %s1155_s13 = int_to_ptr.vmem [resolvable:$true] %s189_s13 }
  0x1b   : > { %s1359_s11 = scalar_select %p1151_p3, 1, 0 }
  0x1c   : > { %p876_p9 = pneg %p1145_p7 }
  0x1f   : > { %s874_s16 = scalar_lea.hbm %s1360_s0, 128 }
  0x20   : > { %p875_p8 = scmp.ne.s32.totalorder %s1360_s0, %s874_s16  ;;  %p881_p10 = scmp.lt.u32.totalorder %s874_s16, %s1360_s0 }
  0x22   : > { %p877_p4 = pnand %p876_p9, %p875_p8 }
  0x24   : > { %p878_p5 = pneg %p877_p4 }
  0x26   : > { %p883_p2 = pnand %p881_p10, %p878_p5 }
  0x28   : > { %886 = shalt.err (!%p883_p2)
}
  0x29   : > { %s887_s28 = scalar_lea.vmem %s180_s9, 128  ;;  %p895_p11 = scmp.lt.s32.totalorder %s180_s9, %s180_s9 }
  0x2a   : > { %p888_p0 = scmp.ne.s32.totalorder %s180_s9, %s887_s28  ;;  %p896_p6 = scmp.lt.s32.totalorder %s887_s28, %s887_s28 }
  0x2c   : > { %p890_p1 = pnand %p888_p0, %p876_p9  ;;  %p897_p13 = por %p896_p6, %p895_p11 }
  0x2e   : > { %p891_p12 = pneg %p890_p1 }
  0x30   : > { %p898_p3 = pnand %p897_p13, %p891_p12 }
  0x32   : > { %901 = shalt.err (!%p898_p3)
}
  0x33   : > { %781 = dma.hbm_to_vmem [thread:$0]  (!%p1145_p7), %s1360_s0, 128, %s180_s9, [#allocation3]  }
  0x34   : > { %s206_s14 = sand.u32 1, %s1034_s21   ;;  %s902_s17 = scalar_lea.hbm %s1340_s1, 1024 }
  0x35   : > { %p903_p1 = scmp.ne.s32.totalorder %s1340_s1, %s902_s17  ;;  %p909_p12 = scmp.lt.u32.totalorder %s902_s17, %s1340_s1 }
  0x37   : > { %p905_p6 = pnand %p903_p1, %p876_p9 }
  0x39   : > { %p906_p11 = pneg %p905_p6 }
  0x3b   : > { %p911_p13 = pnand %p909_p12, %p906_p11 }
  0x3d   : > { %914 = shalt.err (!%p911_p13)
}
  0x3e   : > { %s915_s9 = scalar_lea.vmem %s1155_s13, 1024  ;;  %p923_p5 = scmp.lt.s32.totalorder %s1155_s13, %s1155_s13 }
  0x3f   : > { %p916_p3 = scmp.ne.s32.totalorder %s1155_s13, %s915_s9  ;;  %p924_p10 = scmp.lt.s32.totalorder %s915_s9, %s915_s9 }
  0x41   : > { %p918_p8 = pnand %p916_p3, %p876_p9  ;;  %p925_p2 = por %p924_p10, %p923_p5 }
  0x43   : > { %p919_p4 = pneg %p918_p8 }
  0x45   : > { %p926_p0 = pnand %p925_p2, %p919_p4 }
  0x47   : > { %929 = shalt.err (!%p926_p0)
}
  0x48   : > { %s1038_s8 = smov 128   ;;  %s1039_s12 = smov 8  }
  0x49   : > { %784 = dma.hbm_to_vmem [thread:$0]  (!%p1145_p7), %s1340_s1, 1024, %s1155_s13, [#allocation6], %s1038_s8, %s1038_s8, %s1039_s12  }
  0x4a   : > { %s208_s17 = sand.u32 1, %s1030_s20   ;;  %s707_s25 = sshll.u32 %s1034_s21, 6 }
  0x4b   : > { %s706_s23 = sshll.u32 %s208_s17, 7  ;;  %s1212_s9 = scalar_lea.hbm %s1342_s3, %s707_s25 }
  0x4c   : > { %s210_s0 = scalar_lea.vmem [#allocation7], %s706_s23  ;;  %s1216_s27 = scalar_lea.sflag [#allocation3], %s206_s14 }
  0x4d   : > { %s216_s10 = sshll.u32 %s210_s0, 4  ;;  %s930_s15 = scalar_lea.hbm %s1212_s9, 2048  ;;  %s1214_s10 = int_to_ptr.vmem [resolvable:$true] %s216_s10 }
  0x4e   : > { %p931_p7 = scmp.ne.s32.totalorder %s1212_s9, %s930_s15  ;;  %p1361_p9 = scmp.ne.s32.totalorder %s1359_s11, 0 }
  0x4f   : > { %s935_s16 = scalar_lea.hbm %s1342_s3, 4096  ;;  %p936_p12 = scmp.lt.u32.totalorder %s1212_s9, %s1342_s3 }
  0x50   : > { %p932_p1 = pneg %p1361_p9  ;;  %p937_p13 = scmp.lt.u32.totalorder %s935_s16, %s930_s15 }
  0x51   : > { %p939_p8 = scmp.lt.u32.totalorder %s930_s15, %s1212_s9 }
  0x52   : > { %p933_p6 = pnand %p932_p1, %p931_p7  ;;  %p938_p3 = por %p937_p13, %p936_p12 }
  0x54   : > { %p934_p11 = pneg %p933_p6  ;;  %p940_p4 = por %p939_p8, %p938_p3 }
  0x56   : > { %p941_p5 = pnand %p940_p4, %p934_p11 }
  0x58   : > { %944 = shalt.err (!%p941_p5)
}
  0x59   : > { %s945_s0 = scalar_lea.vmem %s1214_s10, 2048  ;;  %s1040_s14 = smov [#allocation7]  }
  0x5a   : > { %p946_p10 = scmp.ne.s32.totalorder %s1214_s10, %s945_s0  ;;  %s950_s23 = sshll.u32 %s1040_s14, 4  ;;  %s951_s23 = int_to_ptr.vmem [resolvable:$false] %s950_s23 }
  0x5b   : > { %s952_s26 = scalar_lea.vmem %s951_s23, 4096  ;;  %p953_p7 = scmp.lt.s32.totalorder %s1214_s10, %s951_s23 }
  0x5c   : > { %p948_p2 = pnand %p946_p10, %p932_p1  ;;  %p954_p6 = scmp.lt.s32.totalorder %s952_s26, %s945_s0 }
  0x5e   : > { %p949_p0 = pneg %p948_p2  ;;  %p955_p12 = por %p954_p6, %p953_p7 }
  0x60   : > { %p956_p13 = pnand %p955_p12, %p949_p0 }
  0x62   : > { %959 = shalt.err (!%p956_p13)
}
  0x63   : > { %s1041_s28 = smov 64   ;;  %s1042_s15 = smov 4  }
  0x64   : > { %788 = dma.hbm_to_vmem [thread:$0]  (!%p1361_p9), %s1212_s9, 2048, %s1214_s10, %s1216_s27, %s1038_s8, %s1041_s28, %s1042_s15  }
  0x65   : > { %p1362_p1 = scmp.ne.s32.totalorder %s1356_s7, 0 }
  0x66   : > { %p1363_p11 = scmp.eq.s32.totalorder (!%p1362_p1), %s1096_s22, 0 }
  0x67   : > { %234 = sbr.rel (%p1362_p1) target bundleno = 614 (0x266), region = 40 }
  0x6e   : > { %1005 = dma.done.wait (%p1363_p11), [#allocation3], 128   ;;  %p1364_p3 = pmov %p1363_p11 }
  0x70   : > { %1007 = vsyncadd (%p1364_p3), [#allocation3], 4294967168  ;;  %p1365_p8 = pmov %p1364_p3 }
  0x71   : > { %p1366_p4 = pmov %p1364_p3 }
  0x72   : > { %1009 = dma.done.wait (%p1365_p8), [#allocation6], 1024  }
  0x73   : > { %1011 = vsyncadd (%p1366_p4), [#allocation6], 4294966272  ;;  %s244_s11 = sand.u32 1, %s1096_s22   ;;  %s1257_s27 = sand.u32 1, %s1026_s19  }
  0x74   : > { %s711_s7 = sshll.u32 %s1257_s27, 7  ;;  %s245_s8 = scalar_lea.sflag [#allocation3], %s244_s11 }
  0x75   : > { %s1260_s9 = scalar_lea.vmem [#allocation7], %s711_s7  ;;  %p1367_p9 = scmp.ne.s32.totalorder %s1353_s29, 0 }
  0x77   : > { %1013 = dma.done.wait (%p1367_p9), %s245_s8, 2048  }
  0x78   : > { %1015 = vsyncadd (%p1367_p9), %s245_s8, 4294965248  ;;  %v1043_v0 = vmov 0   ;;  %v838_v1 = vld [vmem:[#allocation5 + $0x4] ss:$8 sps:$4 sm:$0xff]   ;;  %v840_v2 = vld [vmem:[#allocation5] ss:$8 sps:$4 sm:$0xff]   ;;  %v295_v27 = vlaneseq }
  0x79   : > { %389 = vmatprep.mubr.bf16.mxu0 %v1043_v0  ;;  %357 = vmatprep.subr.bf16.mxu0 %v838_v1  ;;  %v841_v3 = vld [vmem:[#allocation5 + $0x14] ss:$8 sps:$4 sm:$0xff]   ;;  %v843_v4 = vld [vmem:[#allocation5 + $0x10] ss:$8 sps:$4 sm:$0xff]   ;;  %v844_v5 = vld [vmem:[#allocation5 + $0x24] ss:$8 sps:$4 sm:$0xff]  }
  0x7a   : > { %358 = vmatpush1.bf16.msra.mxu0 %v840_v2  ;;  %v846_v6 = vld [vmem:[#allocation5 + $0x20] ss:$8 sps:$4 sm:$0xff]   ;;  %v847_v7 = vld [vmem:[#allocation5 + $0x34] ss:$8 sps:$4 sm:$0xff]   ;;  %vm353_vm0 = vcmask 523264   ;;  %v296_v28 = vshrl.u32 %v295_v27, 7 }
  0x7b   : > { %359 = vmatprep.subr.bf16.mxu0 %v841_v3  ;;  %v849_v8 = vld [vmem:[#allocation5 + $0x30] ss:$8 sps:$4 sm:$0xff]   ;;  %v850_v11 = vld [vmem:[%s1260_s9 + $0x40] sm:$0xff]   ;;  %v852_v13 = vld [vmem:[%s1260_s9 + $0x48] sm:$0xff]   ;;  %p278_p5 = scmp.lt.s32.totalorder %s1096_s22, 1  ;;  %s712_s25 = sshll.u32 %s1257_s27, 3 }
  0x7c   : > { %v282_v9 = vld [vmem:[#allocation2] sm:$0xff]  ;;  %v851_v12 = vld [vmem:[%s1260_s9] sm:$0xff]   ;;  %744 = vmatprep.subr.bf16.mxu1 %v850_v11  ;;  %v853_v14 = vld [vmem:[%s1260_s9 + $0x8] sm:$0xff]   ;;  %v297_v31 = vsub.s32 0, %v296_v28  ;;  %v301_v32 = vsub.s32 2, %v296_v28  ;;  %s741_s0 = sshll.u32 %s1096_s22, 7 }
  0x7d   : > { %v283_v10 = vpack.c.bf16 %v282_v9, %v282_v9  ;;  %745 = vmatpush3.bf16.msra.mxu1 %v851_v12  ;;  %v854_v15 = vld [vmem:[%s1260_s9 + $0x50] sm:$0xff]   ;;  %v856_v17 = vld [vmem:[%s1260_s9 + $0x58] sm:$0xff]   ;;  %v858_v19 = vld [vmem:[%s1260_s9 + $0x60] sm:$0xff]   ;;  %s279_s13 = scalar_select %p278_p5, %s1096_s22, 1 }
  0x7e   : > { %360 = vmatpush1.bf16.msra.mxu0 %v843_v4  ;;  %746 = vmatprep.subr.bf16.mxu1 %v852_v13  ;;  %v855_v16 = vld [vmem:[%s1260_s9 + $0x10] sm:$0xff]   ;;  %v857_v18 = vld [vmem:[%s1260_s9 + $0x18] sm:$0xff]   ;;  %v859_v20 = vld [vmem:[%s1260_s9 + $0x20] sm:$0xff]   ;;  %s277_s14 = scalar_lea.vmem [#allocation8], %s712_s25  ;;  %s1295_s15 = scalar_lea.hbm %s1344_s5, %s741_s0 }
  0x7f   : > { %361 = vmatprep.subr.bf16.mxu0 %v844_v5  ;;  %v860_v21 = vld [vmem:[%s1260_s9 + $0x68] sm:$0xff]   ;;  %v862_v23 = vld [vmem:[%s1260_s9 + $0x70] sm:$0xff]   ;;  %v864_v25 = vld [vmem:[%s1260_s9 + $0x78] sm:$0xff]   ;;  %s280_s17 = scalar_lea.vmem %s1343_s4, %s279_s13  ;;  %s603_s23 = sshll.u32 %s277_s14, 4  ;;  %s1297_s23 = int_to_ptr.vmem [resolvable:$true] %s603_s23 }
  0x80   : > { %v861_v22 = vld [vmem:[%s1260_s9 + $0x28] sm:$0xff]   ;;  %v863_v24 = vld [vmem:[%s1260_s9 + $0x30] sm:$0xff]   ;;  %v865_v26 = vld [vmem:[%s1260_s9 + $0x38] sm:$0xff]   ;;  %s590_s11 = scalar_lea.sflag [#allocation4], %s1257_s27  ;;  %s960_s7 = scalar_lea.vmem %s1297_s23, 128 }
  0x81   : > { %747 = vmatpush3.bf16.msra.mxu1 %v853_v14  ;;  %v292_v29 = vld [vmem:[%s1341_s2] sm:$0x3]  ;;  %p961_p10 = scmp.ne.s32.totalorder %s1297_s23, %s960_s7  ;;  %p1368_p2 = scmp.ne.s32.totalorder %s1354_s30, 0 }
  0x82   : > { %362 = vmatpush1.bf16.msra.mxu0 %v846_v6  ;;  %748 = vmatprep.subr.bf16.mxu1 %v854_v15  ;;  %v293_v30 = vunpack.c.l.bf16 %v292_v29  ;;  %v446_v55 = vld [vmem:[%s280_s17] sm:$0x1]  ;;  %s1044_s22 = smov [#allocation8]  }
  0x83   : > { %363 = vmatprep.subr.bf16.mxu0 %v847_v7  ;;  %v447_v56 = vunpack.c.l.bf16 %v446_v55  ;;  %p962_p0 = pnand %p961_p10, %p1368_p2  ;;  %s964_s8 = sshll.u32 %s1044_s22, 4  ;;  %s965_s8 = int_to_ptr.vmem [resolvable:$false] %s964_s8 }
  0x84   : > { %v298_v33 = vrot.slane %v293_v30, %v297_v31  ;;  %v302_v34 = vrot.slane %v293_v30, %v301_v32  ;;  %s966_s9 = scalar_lea.vmem %s965_s8, 256  ;;  %p967_p6 = scmp.lt.s32.totalorder %s1297_s23, %s965_s8 }
  0x85   : > { %749 = vmatpush3.bf16.msra.mxu1 %v855_v16  ;;  %v451_v58 = vrot.slane %v447_v56, %v297_v31  ;;  %p963_p7 = pneg %p962_p0  ;;  %p968_p12 = scmp.lt.s32.totalorder %s966_s9, %s960_s7 }
  0x86   : > { %364 = vmatpush1.bf16.msra.mxu0 %v849_v8  ;;  %750 = vmatprep.subr.bf16.mxu1 %v856_v17  ;;  %v308_v35 = vrot.slane %v298_v33, %v297_v31  ;;  %v312_v36 = vrot.slane %v302_v34, %v297_v31 }
  0x87   : > { %p969_p13 = por %p968_p12, %p967_p6 }
  0x89   : > { %721 = vmatmul.mubr.msk.bf16.vlgmr.msra.gmra.mrb[0].mxu0 %vm353_vm0, %v283_v10  ;;  %751 = vmatpush3.bf16.msra.mxu1 %v857_v18  ;;  %p970_p1 = pnand %p969_p13, %p963_p7 }
  0x8a   : > { %752 = vmatprep.subr.bf16.mxu1 %v858_v19 }
  0x8d   : > { %753 = vmatpush3.bf16.msra.mxu1 %v859_v20 }
  0x8e   : > { %754 = vmatprep.subr.bf16.mxu1 %v860_v21 }
  0x91   : > { %755 = vmatpush3.bf16.msra.mxu1 %v861_v22 }
  0x92   : > { %756 = vmatprep.subr.bf16.mxu1 %v862_v23 }
  0x95   : > { %757 = vmatpush3.bf16.msra.mxu1 %v863_v24 }
  0x96   : > { %758 = vmatprep.subr.bf16.mxu1 %v864_v25 }
  0x99   : > { %759 = vmatpush3.bf16.msra.mxu1 %v865_v26 }
 0x15c   : > { %v391_v37 = vpop.f32.mrb[0].mxu0 }
 0x15d   : > { %v392_v38 = vadd.f32 %v391_v37, %v308_v35  ;;  %v393_v39 = vpop.f32.mrb[1].mxu0 }
 0x15e   : > { %v394_v40 = vadd.f32 %v393_v39, %v312_v36  ;;  %v395_v41 = vpop.f32.mrb[2].mxu0 }
 0x15f   : > { %v722_v42 = vmul.f32 -1.442695, %v392_v38  ;;  %v396_v43 = vpop.f32.mrb[3].mxu0 }
 0x160   : > { %v723_v44 = vmul.f32 -1.442695, %v394_v40 }
 0x161   : > { %866 = vpow2.f32 %v722_v42 }
 0x162   : > { %868 = vpow2.f32 %v723_v44 }
 0x16b   : > { %v867_v45 = vpop.eup %866 }
 0x16c   : > { %v869_v46 = vpop.eup %868  ;;  %v404_v47 = vadd.f32 1.0, %v867_v45 }
 0x16d   : > { %v405_v48 = vadd.f32 1.0, %v869_v46 }
 0x16e   : > { %870 = vrcp.f32 %v404_v47 }
 0x16f   : > { %872 = vrcp.f32 %v405_v48 }
 0x178   : > { %v871_v49 = vpop.eup %870 }
 0x179   : > { %v873_v50 = vpop.eup %872  ;;  %v410_v51 = vmul.f32 %v871_v49, %v392_v38 }
 0x17a   : > { %v411_v52 = vmul.f32 %v873_v50, %v394_v40 }
 0x17b   : > { %v412_v54 = vpack.c.bf16 %v410_v51, %v410_v51 }
 0x17c   : > { %v413_v53 = vpack.c.bf16 %v411_v52, %v411_v52 }
 0x17e   : > { %580 = vmatprep.mubr.bf16.mxu1 %v413_v53 }
 0x17f   : > { %581 = vmatmul.mubr.bf16.vlgmr.msra.gmra.mrb[0].mxu1 %v412_v54 }
 0x252   : > { %v760_v57 = vpop.f32.mrb[0].mxu1 }
 0x253   : > { %v761_v59 = vpop.f32.mrb[1].mxu1 }
 0x254   : > { %v762_v60 = vadd.f32 %v761_v59, %v760_v57  ;;  %v763_v61 = vpop.f32.mrb[2].mxu1 }
 0x255   : > { %v764_v62 = vpop.f32.mrb[3].mxu1 }
 0x256   : > { %v583_v63 = vadd.f32 %v762_v60, %v451_v58 }
 0x258   : > { %588 = vst [vmem:[%s277_s14] sm:$0xff] %v583_v63 }
 0x259   : > { %973 = shalt.err (!%p970_p1)
}
 0x25a   : > { %s974_s27 = scalar_lea.hbm %s1295_s15, 128  ;;  %s978_s13 = scalar_lea.hbm %s1344_s5, 256 }
 0x25b   : > { %p975_p11 = scmp.ne.s32.totalorder %s1295_s15, %s974_s27  ;;  %p979_p4 = scmp.lt.u32.totalorder %s1295_s15, %s1344_s5 }
 0x25c   : > { %p980_p9 = scmp.lt.u32.totalorder %s978_s13, %s974_s27  ;;  %p982_p10 = scmp.lt.u32.totalorder %s974_s27, %s1295_s15 }
 0x25d   : > { %p976_p3 = pnand %p975_p11, %p1368_p2 }
 0x25e   : > { %p981_p5 = por %p980_p9, %p979_p4 }
 0x25f   : > { %p977_p8 = pneg %p976_p3 }
 0x260   : > { %p983_p0 = por %p982_p10, %p981_p5 }
 0x262   : > { %p984_p7 = pnand %p983_p0, %p977_p8 }
 0x264   : > { %987 = shalt.err (!%p984_p7)
}
 0x265   : > { %776 = dma.vmem_to_hbm [thread:$0]  (%p1368_p2), %s1297_s23, 128, %s1295_s15, %s590_s11  }
 0x266 PF: > { %s615_s17 = sand.u32 1, %s1022_s18   ;;  %p1369_p6 = scmp.ne.s32.totalorder %s1355_s6, 0 }
 0x267   : > { %p1370_p12 = scmp.ge.s32.totalorder %s1034_s21, 2  ;;  %s616_s25 = scalar_lea.sflag [#allocation4], %s615_s17 }
 0x269   : > { %p790_p13 = pnand %p1370_p12, %p1369_p6 }
 0x26b   : > { %1017 = dma.done.wait (!%p790_p13), %s616_s25, 128  }
 0x26c   : > { %1019 = vsyncadd (!%p790_p13), %s616_s25, 4294967168  ;;  %s1371_s0 = sld [smem:[#allocation13_spill]]  ;;  %p17_p1 = scmp.ge.s32.totalorder %s1100_s24, 4  }
 0x26d   : > { %s1372_s18 = smov %s1026_s19  ;;  %s1373_s19 = smov %s1030_s20 }
 0x26e   : > { %s1375_s21 = smov %s1100_s24  ;;  %19 = sbr.rel (!%p17_p1) target bundleno = 7 (0x7), region = 95 }
 0x272   : > { %s1374_s20 = smov %s1371_s0 }
 0x275   :  { %621 = vsyncpa [#allocation3], 1 }
 0x276   :  { %623 = vsyncpa [#allocation3 + $0x1], 1 }
 0x277   :  { %624 = vsyncpa [#allocation6], 1 }
 0x278   :  { %625 = vsyncpa [#allocation4], 1 }
 0x279   :  { %627 = vsyncpa [#allocation4 + $0x1], 1 }

</bundles_post_ra>
